<compile_context>
chip_gen: v5e
topology: v5e:2x2
jax: 0.10.0
libtpu: 0.0.40
codegen_flags: <defaults>
</compile_context>

<pallas_src>
import functools

import jax
import jax.numpy as jnp
import numpy as np
from jax.experimental import pallas as pl
from jax.experimental.pallas import tpu as pltpu


# ----------------------------- in-kernel helpers -----------------------------

def _gelu(x, *, exact):
    """GELU on an f32 tile.

    exact=True : erf-based GELU via A&S 7.1.26 rational approx (|err|<1.5e-7),
                 exact divide -> stays within 1e-4 of jax.nn.gelu(approximate=False).
    exact=False: tanh-GELU; the transcendental goes to the EUP slot, which is
                 free slack once the kernel is MXU-bound (bf16-weight path).
    """
    if exact:
        a1, a2, a3, a4, a5 = (0.254829592, -0.284496736, 1.421413741,
                              -1.453152027, 1.061405429)
        p = 0.3275911
        z = x * 0.7071067811865476
        sign = jnp.where(z >= 0.0, 1.0, -1.0)
        az = jnp.abs(z)
        t = 1.0 / (1.0 + p * az)
        poly = t * (a1 + t * (a2 + t * (a3 + t * (a4 + t * a5))))
        erf = sign * (1.0 - poly * jnp.exp(-az * az))
        return 0.5 * x * (1.0 + erf)
    c = 0.7978845608028654  # sqrt(2/pi)
    return 0.5 * x * (1.0 + jnp.tanh(c * (x + 0.044715 * x * x * x)))


# --------------------------------- kernels -----------------------------------

def _ffn_reduce_kernel(x_ref, w1_ref, b1_ref, w2_ref, b2_ref, o_ref, acc_ref,
                       *, exact_gelu):
    # grid = (M_tiles, H_tiles); axis 1 (hidden) is the reduction axis.
    k = pl.program_id(1)

    @pl.when(k == 0)
    def _init():
        acc_ref[...] = jnp.zeros_like(acc_ref)

    # x is already in the compute dtype (cast once in the wrapper).
    h = jnp.dot(x_ref[...], w1_ref[...], preferred_element_type=jnp.float32)
    h = _gelu(h + b1_ref[0].astype(jnp.float32), exact=exact_gelu)

    acc_ref[...] += jnp.dot(h.astype(w2_ref.dtype), w2_ref[...],
                            preferred_element_type=jnp.float32)

    @pl.when(k == pl.num_programs(1) - 1)
    def _finalize():
        o_ref[...] = (acc_ref[...] + b2_ref[0].astype(jnp.float32)).astype(o_ref.dtype)


def _ffn_fused_kernel(x_ref, w1_ref, b1_ref, w2_ref, b2_ref, o_ref,
                      *, exact_gelu):
    # Fast path: full hidden dim resident in VMEM, no accumulator / reduction grid.
    h = jnp.dot(x_ref[...], w1_ref[...], preferred_element_type=jnp.float32)
    h = _gelu(h + b1_ref[0].astype(jnp.float32), exact=exact_gelu)
    y = jnp.dot(h.astype(w2_ref.dtype), w2_ref[...],
                preferred_element_type=jnp.float32)
    o_ref[...] = (y + b2_ref[0].astype(jnp.float32)).astype(o_ref.dtype)


# ------------------------------ tile selection --------------------------------

def _cdiv(a, b):
    return -(-a // b)


def _round_up(n, m):
    return _cdiv(n, m) * m


def _get_vmem_capacity():
    try:
        info = pltpu.get_tpu_info()
        cap = int(getattr(info, "vmem_capacity_bytes", 0))
        if cap > 0:
            return cap
    except Exception:
        pass
    return 64 << 20  # conservative default (v7x per-TC VMEM)


def _fused_vmem_bytes(tm, D, H, xb, wb, ob):
    return (2 * tm * D * xb                       # x (double-buffered)
            + 2 * D * H * wb + 2 * H * D * wb     # W1, W2 (full)
            + 2 * tm * D * ob                     # out
            + tm * H * 4 + tm * H * wb            # h f32 + cast copy
            + tm * D * 4                          # 2nd matmul f32 result
            + 2 * 8 * H * 4 + 2 * 8 * D * 4)      # biases (sublane-padded)


def _reduce_vmem_bytes(tm, th, D, xb, wb, ob):
    return (2 * tm * D * xb                       # x
            + 2 * D * th * wb                     # W1 column tile
            + 2 * th * D * wb                     # W2 row tile
            + 2 * tm * D * ob                     # out
            + tm * D * 4                          # f32 accumulator scratch
            + tm * th * 4 + tm * th * wb          # h f32 + cast copy
            + 2 * 8 * th * 4 + 2 * 8 * D * 4)     # biases


def _vmem_limit(need_bytes, vmem_cap):
    limit = max(int(need_bytes * 1.3) + (2 << 20), 32 << 20)
    return min(limit, int(vmem_cap * 0.9))


def _select_config(M, D, H, x_bytes, w_bytes, out_bytes):
    """Returns (tm, th, m_pad, fused, vmem_limit_bytes)."""
    vmem_cap = _get_vmem_capacity()
    budget = int(vmem_cap * 0.80)                 # headroom for compiler scratch
    small_vmem = vmem_cap <= (80 << 20)           # v7x-like: 64 MiB per TC

    # tm targets the per-generation MXU/HBM ridge (weights re-streamed per M tile);
    # smaller on v7x to fit 64 MiB, th shrunk to compensate.
    tm_target = 512 if small_vmem else 1024
    th_target = 512 if small_vmem else 1024

    n_tiles = _cdiv(M, tm_target)
    # v7x has 2 TensorCores: make the "parallel" M axis have >= 2 programs.
    if small_vmem and n_tiles == 1 and M >= 32:
        n_tiles = 2

    while True:
        tm = _round_up(_cdiv(M, n_tiles), 16)     # multiple of 16 (bf16 packing)
        m_pad = n_tiles * tm

        need = _fused_vmem_bytes(tm, D, H, x_bytes, w_bytes, out_bytes)
        if need <= budget:
            return tm, H, m_pad, True, _vmem_limit(need, vmem_cap)

        th_hi = min(th_target, (H // 128) * 128)
        for th in range(th_hi, 127, -128):
            if H % th:
                continue
            need = _reduce_vmem_bytes(tm, th, D, x_bytes, w_bytes, out_bytes)
            if need <= budget:
                return tm, th, m_pad, False, _vmem_limit(need, vmem_cap)

        if tm <= 16:
            break
        n_tiles *= 2                              # shrink tm and retry

    # Last resort: smallest tiling, generous limit (compile-time failure, if any,
    # is explicit rather than a silent wrong answer).
    tm = 16
    m_pad = _round_up(max(M, 1), tm)
    th = 128 if (H % 128 == 0 and H >= 128) else H
    need = _reduce_vmem_bytes(tm, th, D, x_bytes, w_bytes, out_bytes)
    return tm, th, m_pad, False, _vmem_limit(need, vmem_cap)


# --------------------------------- wrapper -----------------------------------

def prepare_params(w1, b1, w2, b2, compute_dtype=jnp.float32):
    """Call ONCE at init: pre-transpose PyTorch (out, in) weights to (in, out)
    and cast matmul operands to compute_dtype (bf16 for MXU-rate matmuls on
    v6e/v7x).  Biases stay f32 (added after the f32 accumulation)."""
    return {
        "w1": jnp.asarray(w1, jnp.float32).T.astype(compute_dtype),   # (D, 4D)
        "b1": jnp.asarray(b1, jnp.float32).reshape(1, -1),            # (1, 4D)
        "w2": jnp.asarray(w2, jnp.float32).T.astype(compute_dtype),   # (4D, D)
        "b2": jnp.asarray(b2, jnp.float32).reshape(1, -1),            # (1, D)
    }


def feed_forward(x, p, *, out_dtype=None):
    w1, b1, w2, b2 = p["w1"], p["b1"], p["w2"], p["b2"]
    orig_shape = x.shape
    D = orig_shape[-1]
    H = w1.shape[1]                                   # 4 * D
    M = 1
    for s in orig_shape[:-1]:
        M *= int(s)
    M = max(M, 1)

    cdt = w1.dtype                                    # compute dtype (f32 or bf16)
    out_dtype = out_dtype or x.dtype
    exact_gelu = (jnp.dtype(cdt) == jnp.dtype(jnp.float32))

    # Lane-dense (M, D) slab; cast to compute dtype ONCE here (not per k-step).
    x2 = x.reshape(M, D).astype(cdt)

    tm, th, m_pad, fused, vmem_limit = _select_config(
        M, D, H,
        jnp.dtype(cdt).itemsize, jnp.dtype(cdt).itemsize,
        jnp.dtype(out_dtype).itemsize)

    if m_pad != M:
        x2 = jnp.pad(x2, ((0, m_pad - M), (0, 0)))

    if fused:
        grid = (m_pad // tm,)
        out = pl.pallas_call(
            functools.partial(_ffn_fused_kernel, exact_gelu=exact_gelu),
            out_shape=jax.ShapeDtypeStruct((m_pad, D), out_dtype),
            grid=grid,
            in_specs=[
                pl.BlockSpec((tm, D), lambda i: (i, 0)),   # x tile
                pl.BlockSpec((D, H), lambda i: (0, 0)),    # W1^T (full)
                pl.BlockSpec((1, H), lambda i: (0, 0)),    # b1
                pl.BlockSpec((H, D), lambda i: (0, 0)),    # W2^T (full)
                pl.BlockSpec((1, D), lambda i: (0, 0)),    # b2
            ],
            out_specs=pl.BlockSpec((tm, D), lambda i: (i, 0)),
            compiler_params=pltpu.CompilerParams(
                dimension_semantics=("parallel",),
                vmem_limit_bytes=vmem_limit),
        )(x2, w1, b1, w2, b2)
    else:
        grid = (m_pad // tm, H // th)
        out = pl.pallas_call(
            functools.partial(_ffn_reduce_kernel, exact_gelu=exact_gelu),
            out_shape=jax.ShapeDtypeStruct((m_pad, D), out_dtype),
            grid=grid,
            in_specs=[
                pl.BlockSpec((tm, D), lambda i, k: (i, 0)),   # x tile (resident over k)
                pl.BlockSpec((D, th), lambda i, k: (0, k)),   # W1^T column tile
                pl.BlockSpec((1, th), lambda i, k: (0, k)),   # b1 tile
                pl.BlockSpec((th, D), lambda i, k: (k, 0)),   # W2^T row tile
                pl.BlockSpec((1, D), lambda i, k: (0, 0)),    # b2
            ],
            out_specs=pl.BlockSpec((tm, D), lambda i, k: (i, 0)),
            scratch_shapes=[pltpu.VMEM((tm, D), jnp.float32)],   # f32 accumulator
            compiler_params=pltpu.CompilerParams(
                dimension_semantics=("parallel", "arbitrary"),
                vmem_limit_bytes=vmem_limit),
        )(x2, w1, b1, w2, b2)

    if m_pad != M:
        out = out[:M]
    return out.reshape(orig_shape[:-1] + (D,))


# ------------------------------ pure-JAX reference ---------------------------

def feed_forward_ref(x, w1, b1, w2, b2):
    h = jax.nn.gelu(x @ w1.T + b1, approximate=False)   # exact GELU, like nn.GELU()
    return h @ w2.T + b2


# ----------------------------------- main ------------------------------------

if __name__ == "__main__":
    cfg = dict(emb_dim=32)
    B, S, D = 2, 8, cfg["emb_dim"]
    D4 = 4 * D

    key = jax.random.PRNGKey(0)
    k0, k1, k2, k3, k4 = jax.random.split(key, 5)

    x = jax.random.normal(k0, (B, S, D), jnp.float32)
    # PyTorch nn.Linear layout: weight is (out_features, in_features)
    w1 = 0.05 * jax.random.normal(k1, (D4, D), jnp.float32)
    b1 = 0.05 * jax.random.normal(k2, (D4,), jnp.float32)
    w2 = 0.05 * jax.random.normal(k3, (D, D4), jnp.float32)
    b2 = 0.05 * jax.random.normal(k4, (D,), jnp.float32)

    y_ref = feed_forward_ref(x, w1, b1, w2, b2)

    # f32-operand path: exact-semantics verification (exact-erf GELU).
    p_f32 = prepare_params(w1, b1, w2, b2, compute_dtype=jnp.float32)
    y = jax.block_until_ready(feed_forward(x, p_f32))
    assert y.shape == (B, S, D) and y.dtype == jnp.float32
    np.testing.assert_allclose(np.asarray(y), np.asarray(y_ref), rtol=1e-4, atol=1e-4)

    # bf16-operand path (MXU-rate matmuls, f32 accumulation, tanh-GELU on EUP).
    p_bf16 = prepare_params(w1, b1, w2, b2, compute_dtype=jnp.bfloat16)
    y_bf = jax.block_until_ready(feed_forward(x, p_bf16))
    np.testing.assert_allclose(np.asarray(y_bf), np.asarray(y_ref), rtol=3e-2, atol=3e-2)

    print("KERNEL_OK")
</pallas_src>

<mosaic_0001>
module attributes {stable_mosaic.version = 11 : i64} {
  func.func @_ffn_fused_kernel(%arg0: i32, %arg1: memref<16x32xf32, #tpu.memory_space<vmem>>, %arg2: memref<32x128xf32, #tpu.memory_space<vmem>>, %arg3: memref<1x128xf32, #tpu.memory_space<vmem>>, %arg4: memref<128x32xf32, #tpu.memory_space<vmem>>, %arg5: memref<1x32xf32, #tpu.memory_space<vmem>>, %arg6: memref<16x32xf32, #tpu.memory_space<vmem>>) attributes {dimension_semantics = [#tpu.dimension_semantics<parallel>], iteration_bounds = array<i64: 1>, scalar_prefetch = 0 : i64, scratch_operands = 0 : i64, tpu.core_type = #tpu.core_type<tc>, window_params = [{transform_indices = @transform_0, window_bounds = array<i64: 16, 32>}, {pipeline_mode = #tpu.pipeline_mode<synchronous>, transform_indices = @transform_1, window_bounds = array<i64: 32, 128>}, {pipeline_mode = #tpu.pipeline_mode<synchronous>, transform_indices = @transform_2, window_bounds = array<i64: 1, 128>}, {pipeline_mode = #tpu.pipeline_mode<synchronous>, transform_indices = @transform_3, window_bounds = array<i64: 128, 32>}, {pipeline_mode = #tpu.pipeline_mode<synchronous>, transform_indices = @transform_4, window_bounds = array<i64: 1, 32>}, {transform_indices = @transform_5, window_bounds = array<i64: 16, 32>}]} {
    %c0 = arith.constant 0 : index
    %c0_0 = arith.constant 0 : index
    %0 = vector.load %arg1[%c0, %c0_0] : memref<16x32xf32, #tpu.memory_space<vmem>>, vector<16x32xf32>
    %c0_1 = arith.constant 0 : index
    %c0_2 = arith.constant 0 : index
    %1 = vector.load %arg2[%c0_1, %c0_2] : memref<32x128xf32, #tpu.memory_space<vmem>>, vector<32x128xf32>
    %cst = arith.constant dense<0.000000e+00> : vector<16x128xf32>
    %2 = tpu.matmul %0, %1, %cst {dimension_numbers = #tpu.dot_dimension_numbers<[1], [0], [0], [1], [0, 0, 1, 1], [], []>} : vector<16x32xf32>, vector<32x128xf32>, vector<16x128xf32> -> vector<16x128xf32>
    %c0_3 = arith.constant 0 : index
    %c0_4 = arith.constant 0 : index
    %3 = vector.load %arg3[%c0_3, %c0_4] : memref<1x128xf32, #tpu.memory_space<vmem>>, vector<1x128xf32>
    %4 = vector.shape_cast %3 : vector<1x128xf32> to vector<128xf32>
    %5 = vector.shape_cast %4 : vector<128xf32> to vector<1x128xf32>
    %6 = vector.broadcast %5 : vector<1x128xf32> to vector<16x128xf32>
    %7 = arith.addf %2, %6 : vector<16x128xf32>
    %cst_5 = arith.constant 0.707106769 : f32
    %8 = vector.broadcast %cst_5 : f32 to vector<16x128xf32>
    %9 = arith.mulf %7, %8 : vector<16x128xf32>
    %cst_6 = arith.constant 0.000000e+00 : f32
    %10 = vector.broadcast %cst_6 : f32 to vector<16x128xf32>
    %11 = arith.cmpf oge, %9, %10 : vector<16x128xf32>
    %cst_7 = arith.constant 1.000000e+00 : f32
    %cst_8 = arith.constant -1.000000e+00 : f32
    %12 = vector.broadcast %cst_7 : f32 to vector<16x128xf32>
    %13 = vector.broadcast %cst_8 : f32 to vector<16x128xf32>
    %14 = arith.select %11, %12, %13 : vector<16x128xi1>, vector<16x128xf32>
    %15 = math.absf %9 : vector<16x128xf32>
    %cst_9 = arith.constant 0.327591091 : f32
    %16 = vector.broadcast %cst_9 : f32 to vector<16x128xf32>
    %17 = arith.mulf %16, %15 : vector<16x128xf32>
    %cst_10 = arith.constant 1.000000e+00 : f32
    %18 = vector.broadcast %cst_10 : f32 to vector<16x128xf32>
    %19 = arith.addf %18, %17 : vector<16x128xf32>
    %cst_11 = arith.constant 1.000000e+00 : f32
    %20 = vector.broadcast %cst_11 : f32 to vector<16x128xf32>
    %21 = arith.divf %20, %19 : vector<16x128xf32>
    %cst_12 = arith.constant 1.06140542 : f32
    %22 = vector.broadcast %cst_12 : f32 to vector<16x128xf32>
    %23 = arith.mulf %21, %22 : vector<16x128xf32>
    %cst_13 = arith.constant -1.45315206 : f32
    %24 = vector.broadcast %cst_13 : f32 to vector<16x128xf32>
    %25 = arith.addf %24, %23 : vector<16x128xf32>
    %26 = arith.mulf %21, %25 : vector<16x128xf32>
    %cst_14 = arith.constant 1.42141378 : f32
    %27 = vector.broadcast %cst_14 : f32 to vector<16x128xf32>
    %28 = arith.addf %27, %26 : vector<16x128xf32>
    %29 = arith.mulf %21, %28 : vector<16x128xf32>
    %cst_15 = arith.constant -0.284496725 : f32
    %30 = vector.broadcast %cst_15 : f32 to vector<16x128xf32>
    %31 = arith.addf %30, %29 : vector<16x128xf32>
    %32 = arith.mulf %21, %31 : vector<16x128xf32>
    %cst_16 = arith.constant 0.254829586 : f32
    %33 = vector.broadcast %cst_16 : f32 to vector<16x128xf32>
    %34 = arith.addf %33, %32 : vector<16x128xf32>
    %35 = arith.mulf %21, %34 : vector<16x128xf32>
    %cst_17 = arith.constant 0.000000e+00 : f32
    %36 = vector.broadcast %cst_17 : f32 to vector<16x128xf32>
    %37 = arith.subf %36, %15 : vector<16x128xf32>
    %38 = arith.mulf %37, %15 : vector<16x128xf32>
    %39 = math.exp %38 : vector<16x128xf32>
    %40 = arith.mulf %35, %39 : vector<16x128xf32>
    %cst_18 = arith.constant 1.000000e+00 : f32
    %41 = vector.broadcast %cst_18 : f32 to vector<16x128xf32>
    %42 = arith.subf %41, %40 : vector<16x128xf32>
    %43 = arith.mulf %14, %42 : vector<16x128xf32>
    %cst_19 = arith.constant 5.000000e-01 : f32
    %44 = vector.broadcast %cst_19 : f32 to vector<16x128xf32>
    %45 = arith.mulf %44, %7 : vector<16x128xf32>
    %cst_20 = arith.constant 1.000000e+00 : f32
    %46 = vector.broadcast %cst_20 : f32 to vector<16x128xf32>
    %47 = arith.addf %46, %43 : vector<16x128xf32>
    %48 = arith.mulf %45, %47 : vector<16x128xf32>
    %c0_21 = arith.constant 0 : index
    %c0_22 = arith.constant 0 : index
    %49 = vector.load %arg4[%c0_21, %c0_22] : memref<128x32xf32, #tpu.memory_space<vmem>>, vector<128x32xf32>
    %cst_23 = arith.constant dense<0.000000e+00> : vector<16x32xf32>
    %50 = tpu.matmul %48, %49, %cst_23 {dimension_numbers = #tpu.dot_dimension_numbers<[1], [0], [0], [1], [0, 0, 1, 1], [], []>} : vector<16x128xf32>, vector<128x32xf32>, vector<16x32xf32> -> vector<16x32xf32>
    %c0_24 = arith.constant 0 : index
    %c0_25 = arith.constant 0 : index
    %51 = vector.load %arg5[%c0_24, %c0_25] : memref<1x32xf32, #tpu.memory_space<vmem>>, vector<1x32xf32>
    %52 = vector.shape_cast %51 : vector<1x32xf32> to vector<32xf32>
    %53 = vector.shape_cast %52 : vector<32xf32> to vector<1x32xf32>
    %54 = vector.broadcast %53 : vector<1x32xf32> to vector<16x32xf32>
    %55 = arith.addf %50, %54 : vector<16x32xf32>
    %c0_26 = arith.constant 0 : index
    %c0_27 = arith.constant 0 : index
    %56 = vector.load %arg6[%c0_26, %c0_27] : memref<16x32xf32, #tpu.memory_space<vmem>>, vector<16x32xf32>
    tpu.vector_store %arg6[%c0_26, %c0_27], %55 {strides = array<i32>} : memref<16x32xf32, #tpu.memory_space<vmem>>, vector<16x32xf32>,
    return
  }
  func.func @transform_0(%arg0: i32) -> (i32, i32) {
    %c0_i32 = arith.constant 0 : i32
    %c0_i32_0 = arith.constant 0 : i32
    return %arg0, %c0_i32 : i32, i32
  }
  func.func @transform_1(%arg0: i32) -> (i32, i32) {
    %c0_i32 = arith.constant 0 : i32
    %c0_i32_0 = arith.constant 0 : i32
    %c0_i32_1 = arith.constant 0 : i32
    return %c0_i32, %c0_i32_0 : i32, i32
  }
  func.func @transform_2(%arg0: i32) -> (i32, i32) {
    %c0_i32 = arith.constant 0 : i32
    %c0_i32_0 = arith.constant 0 : i32
    %c0_i32_1 = arith.constant 0 : i32
    return %c0_i32, %c0_i32_0 : i32, i32
  }
  func.func @transform_3(%arg0: i32) -> (i32, i32) {
    %c0_i32 = arith.constant 0 : i32
    %c0_i32_0 = arith.constant 0 : i32
    %c0_i32_1 = arith.constant 0 : i32
    return %c0_i32, %c0_i32_0 : i32, i32
  }
  func.func @transform_4(%arg0: i32) -> (i32, i32) {
    %c0_i32 = arith.constant 0 : i32
    %c0_i32_0 = arith.constant 0 : i32
    %c0_i32_1 = arith.constant 0 : i32
    return %c0_i32, %c0_i32_0 : i32, i32
  }
  func.func @transform_5(%arg0: i32) -> (i32, i32) {
    %c0_i32 = arith.constant 0 : i32
    %c0_i32_0 = arith.constant 0 : i32
    return %arg0, %c0_i32 : i32, i32
  }
}

</mosaic_0001>

<bundles_post_ra>
// kernel: tpu_custom_call.1
= control target key start
LH: loop header
LB: loop body
LE: loop exit
PB: predicated region body
PF: predicated region fallthrough
CT: control target
= control target key end

     0   :  { %s396_s0 = inlined_call_operand.vmem [shape: f32[16,32], index: 0, kind: input, shape index: {}]   ;;  %s397_s1 = inlined_call_operand.vmem [shape: f32[32,128], index: 1, kind: input, shape index: {}]   ;;  %s398_s2 = inlined_call_operand.vmem [shape: f32[1,128], index: 2, kind: input, shape index: {}]   ;;  %s399_s3 = inlined_call_operand.vmem [shape: f32[128,32], index: 3, kind: input, shape index: {}]   ;;  %s400_s4 = inlined_call_operand.vmem [shape: f32[1,32], index: 4, kind: input, shape index: {}]   ;;  %s401_s5 = inlined_call_operand.hbm [shape: f32[16,32], index: 5, kind: output, shape index: {}]  }
   0x1   :  { %v26_v0 = vld [vmem:[%s397_s1 + $0x18] sm:$0xff]  ;;  %v25_v1 = vld [vmem:[%s397_s1 + $0x10] sm:$0xff]  ;;  %v24_v2 = vld [vmem:[%s397_s1 + $0x8] sm:$0xff] }
   0x2   :  { %50 = vmatpush.msra.mxu0 %v26_v0 }
   0x4   :  { %51 = vmatpush.msra.mxu0 %v25_v1 }
   0x5   :  { %10 = vsyncpa [#allocation3], 0  ;;  %v23_v3 = vld [vmem:[%s397_s1] sm:$0xff]  ;;  %vm31_vm0 = vcmask 261120   ;;  %v22_v5 = vld [vmem:[%s396_s0 + $0x8] sm:$0xff]  ;;  %s192_s14 = sshll.u32 %s401_s5, 4  ;;  %s193_s14 = int_to_ptr.hbm [resolvable:$true] %s192_s14 }
   0x6   :  { %52 = vmatpush.msra.mxu0 %v24_v2  ;;  %v21_v4 = vld [vmem:[%s396_s0] sm:$0xff]  ;;  %v156_v6 = vld [vmem:[%s399_s3 + $0x78] sm:$0xff]  ;;  %v155_v7 = vld [vmem:[%s399_s3 + $0x70] sm:$0xff]  ;;  %s263_s0 = smov [#allocation2]   ;;  %s264_s15 = smov 128  }
   0x7   :  { %161 = vmatpush.msra.mxu1 %v156_v6  ;;  %206 = vmatpush.msra.mxu2 %v156_v6  ;;  %v154_v8 = vld [vmem:[%s399_s3 + $0x68] sm:$0xff]  ;;  %v153_v9 = vld [vmem:[%s399_s3 + $0x60] sm:$0xff]  ;;  %v152_v11 = vld [vmem:[%s399_s3 + $0x58] sm:$0xff]  ;;  %s190_s11 = sshll.u32 %s263_s0, 4  ;;  %s265_s16 = smov 8   ;;  %s191_s11 = int_to_ptr.vmem [resolvable:$true] %s190_s11 }
   0x8   :  { %53 = vmatpush.msra.mxu0 %v23_v3  ;;  %v226_v10 = vld [vmem:[%s398_s2] ss:$0 sm:$0xff]  ;;  %v151_v13 = vld [vmem:[%s399_s3 + $0x50] sm:$0xff]  ;;  %v150_v15 = vld [vmem:[%s399_s3 + $0x48] sm:$0xff] }
   0x9   :  { %204 = vmatmul.msk.f32.vlgmr.msra.gmra.mxu0 %vm31_vm0, %v21_v4  ;;  %162 = vmatpush.msra.mxu1 %v155_v7  ;;  %v149_v17 = vld [vmem:[%s399_s3 + $0x40] sm:$0xff]  ;;  %v148_v19 = vld [vmem:[%s399_s3 + $0x38] sm:$0xff]  ;;  %v147_v22 = vld [vmem:[%s399_s3 + $0x30] sm:$0xff] }
   0xa   :  { %207 = vmatpush.msra.mxu2 %v155_v7  ;;  %v146_v25 = vld [vmem:[%s399_s3 + $0x28] sm:$0xff]  ;;  %v145_v27 = vld [vmem:[%s399_s3 + $0x20] sm:$0xff]  ;;  %v144_v29 = vld [vmem:[%s399_s3 + $0x18] sm:$0xff] }
   0xb   :  { %163 = vmatpush.msra.mxu1 %v154_v8  ;;  %v143_v31 = vld [vmem:[%s399_s3 + $0x10] sm:$0xff]  ;;  %v142_v35 = vld [vmem:[%s399_s3 + $0x8] sm:$0xff]  ;;  %v141_v37 = vld [vmem:[%s399_s3] sm:$0xff] }
   0xc   :  { %208 = vmatpush.msra.mxu2 %v154_v8 }
   0xd   :  { %164 = vmatpush.msra.mxu1 %v153_v9 }
   0xe   :  { %209 = vmatpush.msra.mxu2 %v153_v9 }
   0xf   :  { %165 = vmatpush.msra.mxu1 %v152_v11 }
  0x10   :  { %210 = vmatpush.msra.mxu2 %v152_v11 }
  0x11   :  { %205 = vmatmul.msk.f32.gmra.mxu0 %vm31_vm0, %v22_v5  ;;  %166 = vmatpush.msra.mxu1 %v151_v13 }
  0x12   :  { %211 = vmatpush.msra.mxu2 %v151_v13 }
  0x13   :  { %167 = vmatpush.msra.mxu1 %v150_v15 }
  0x14   :  { %212 = vmatpush.msra.mxu2 %v150_v15 }
  0x15   :  { %168 = vmatpush.msra.mxu1 %v149_v17 }
  0x16   :  { %213 = vmatpush.msra.mxu2 %v149_v17 }
  0x17   :  { %169 = vmatpush.msra.mxu1 %v148_v19 }
  0x18   :  { %214 = vmatpush.msra.mxu2 %v148_v19 }
  0x19   :  { %170 = vmatpush.msra.mxu1 %v147_v22 }
  0x1a   :  { %215 = vmatpush.msra.mxu2 %v147_v22 }
  0x1b   :  { %171 = vmatpush.msra.mxu1 %v146_v25 }
  0x1c   :  { %216 = vmatpush.msra.mxu2 %v146_v25 }
  0x1d   :  { %172 = vmatpush.msra.mxu1 %v145_v27 }
  0x1e   :  { %217 = vmatpush.msra.mxu2 %v145_v27 }
  0x1f   :  { %173 = vmatpush.msra.mxu1 %v144_v29 }
  0x20   :  { %218 = vmatpush.msra.mxu2 %v144_v29 }
  0x21   :  { %174 = vmatpush.msra.mxu1 %v143_v31 }
  0x22   :  { %219 = vmatpush.msra.mxu2 %v143_v31 }
  0x23   :  { %175 = vmatpush.msra.mxu1 %v142_v35 }
  0x24   :  { %220 = vmatpush.msra.mxu2 %v142_v35 }
  0x25   :  { %176 = vmatpush.msra.mxu1 %v141_v37 }
  0x26   :  { %221 = vmatpush.msra.mxu2 %v141_v37 }
  0x86   :  { %v55_v12 = vpop.f32.mrf.mxu0 }
  0x87   :  { %v337_v14 = vadd.f32 %v226_v10, %v55_v12 }
  0x89   :  { %v343_v16 = vmul.f32 0.70710677, %v337_v14  ;;  %v135_v22 = vmul.f32 0.5, %v337_v14  ;;  %v227_v14 = vld [vmem:[%s400_s4] ss:$0 sm:$0xff] }
  0x8b   :  { %v349_v18 = vand.u32 2147483647, %v343_v16  ;;  %vm63_vm9 = vcmp.ge.f32.partialorder %v343_v16, 0.0 }
  0x8d   :  { %v69_v20 = vmul.f32 0.3275911, %v349_v18  ;;  %v121_v46 = vsub.f32 0.0, %v349_v18 }
  0x8e   :  { %v58_v21 = vpop.f32.mrf.mxu0 }
  0x8f   :  { %v71_v23 = vadd.f32 1.0, %v69_v20  ;;  %v358_v24 = vadd.f32 %v226_v10, %v58_v21  ;;  %v123_v54 = vmul.f32 %v121_v46, %v349_v18  ;;  %v262_v18 = vmov -1.0  }
  0x90   :  { %v65_v19 = vsel %vm63_vm9, 1.0, %v262_v18 }
  0x91   :  { %228 = vrcp.f32 %v71_v23  ;;  %v364_v26 = vmul.f32 0.70710677, %v358_v24  ;;  %v84_v38 = vand.u32 2147483648, %v71_v23  ;;  %v82_v40 = vand.u32 2147483647, %v71_v23 }
  0x92   :  { %vm78_vm2 = vweird.f32 %v71_v23  ;;  %v125_v60 = vmul.f32 1.442695, %v123_v54 }
  0x93   :  { %v68_v28 = vand.u32 2147483647, %v364_v26  ;;  %v85_v43 = vor.u32 1.1754944e-38, %v84_v38  ;;  %vm83_vm4 = vcmp.eq.f32.partialorder %v82_v40, 8.507059e+37  ;;  %vm64_vm10 = vcmp.ge.f32.partialorder %v364_v26, 0.0 }
  0x95   :  { %v70_v30 = vmul.f32 0.3275911, %v68_v28  ;;  %v122_v61 = vsub.f32 0.0, %v68_v28 }
  0x97   :  { %v229_v32 = vpop.eup %228  ;;  %v72_v33 = vadd.f32 1.0, %v70_v30  ;;  %v124_v3 = vmul.f32 %v122_v61, %v68_v28  ;;  %v66_v30 = vsel %vm64_vm10, 1.0, %v262_v18 }
  0x98   :  { %v74_v34 = vmul.f32 %v229_v32, %v71_v23  ;;  %vm79_vm1 = vweird.f32 %v229_v32 }
  0x99   :  { %230 = vrcp.f32 %v72_v33  ;;  %vm80_vm3 = vmor %vm78_vm2, %vm79_vm1  ;;  %v99_v50 = vand.u32 2147483648, %v72_v33  ;;  %v97_v53 = vand.u32 2147483647, %v72_v33  ;;  %vm93_vm6 = vweird.f32 %v72_v33 }
  0x9a   :  { %v75_v36 = vsub.f32 1.0, %v74_v34  ;;  %232 = vpow2.f32 %v125_v60  ;;  %v127_v8 = vmul.f32 1.442695, %v124_v3 }
  0x9b   :  { %v100_v57 = vor.u32 1.1754944e-38, %v99_v50  ;;  %vm98_vm8 = vcmp.eq.f32.partialorder %v97_v53, 8.507059e+37 }
  0x9c   :  { %v76_v39 = vmul.f32 %v229_v32, %v75_v36  ;;  %234 = vpow2.f32 %v127_v8 }
  0x9e   :  { %v77_v41 = vadd.f32 %v229_v32, %v76_v39 }
  0x9f   :  { %v231_v42 = vpop.eup %230 }
  0xa0   :  { %v89_v44 = vmul.f32 %v231_v42, %v72_v33  ;;  %v81_v45 = vsel %vm80_vm3, %v229_v32, %v77_v41  ;;  %vm94_vm5 = vweird.f32 %v231_v42  ;;  %v233_v11 = vpop.eup %232  ;;  %v136_v32 = vmul.f32 0.5, %v358_v24 }
  0xa1   :  { %v86_v47 = vsel %vm83_vm4, %v85_v43, %v81_v45  ;;  %vm95_vm7 = vmor %vm93_vm6, %vm94_vm5 }
  0xa2   :  { %v90_v48 = vsub.f32 1.0, %v89_v44  ;;  %v103_v49 = vmul.f32 1.0614054, %v86_v47  ;;  %v235_v27 = vpop.eup %234 }
  0xa4   :  { %v105_v51 = vadd.f32 -1.4531521, %v103_v49  ;;  %v91_v52 = vmul.f32 %v231_v42, %v90_v48 }
  0xa6   :  { %v107_v55 = vmul.f32 %v105_v51, %v86_v47  ;;  %v92_v56 = vadd.f32 %v231_v42, %v91_v52 }
  0xa8   :  { %v109_v58 = vadd.f32 1.4214138, %v107_v55  ;;  %v96_v59 = vsel %vm95_vm7, %v231_v42, %v92_v56 }
  0xa9   :  { %v101_v62 = vsel %vm98_vm8, %v100_v57, %v96_v59 }
  0xaa   :  { %v111_v63 = vmul.f32 %v109_v58, %v86_v47  ;;  %v104_v0 = vmul.f32 1.0614054, %v101_v62 }
  0xac   :  { %v113_v1 = vadd.f32 -0.28449672, %v111_v63  ;;  %v106_v2 = vadd.f32 -1.4531521, %v104_v0 }
  0xae   :  { %v115_v4 = vmul.f32 %v113_v1, %v86_v47  ;;  %v108_v5 = vmul.f32 %v106_v2, %v101_v62 }
  0xb0   :  { %v117_v6 = vadd.f32 0.2548296, %v115_v4  ;;  %v110_v7 = vadd.f32 1.4214138, %v108_v5 }
  0xb2   :  { %v119_v9 = vmul.f32 %v117_v6, %v86_v47  ;;  %v112_v10 = vmul.f32 %v110_v7, %v101_v62 }
  0xb4   :  { %v129_v12 = vmul.f32 %v233_v11, %v119_v9  ;;  %v114_v13 = vadd.f32 -0.28449672, %v112_v10 }
  0xb6   :  { %v131_v15 = vsub.f32 1.0, %v129_v12  ;;  %v116_v17 = vmul.f32 %v114_v13, %v101_v62 }
  0xb8   :  { %v133_v20 = vmul.f32 %v131_v15, %v65_v19  ;;  %v118_v21 = vadd.f32 0.2548296, %v116_v17 }
  0xba   :  { %v137_v23 = vadd.f32 1.0, %v133_v20  ;;  %v120_v25 = vmul.f32 %v118_v21, %v101_v62 }
  0xbc   :  { %v139_v28 = vmul.f32 %v137_v23, %v135_v22  ;;  %v130_v29 = vmul.f32 %v235_v27, %v120_v25 }
  0xbe   :  { %177 = vmatmul.f32.vlgmr.msra.gmra.mxu1 %v139_v28  ;;  %v132_v16 = vsub.f32 1.0, %v130_v29 }
  0xc0   :  { %v134_v31 = vmul.f32 %v132_v16, %v66_v30 }
  0xc2   :  { %v138_v33 = vadd.f32 1.0, %v134_v31 }
  0xc4   :  { %v140_v34 = vmul.f32 %v138_v33, %v136_v32 }
  0xc6   :  { %180 = vmatmul.f32.vlgmr.msra.gmra.mxu2 %v140_v34 }
 0x13b   :  { %v178_v35 = vpop.f32.mrf.mxu1 }
 0x13c   :  { %v179_v36 = vadd.f32 %v227_v14, %v178_v35 }
 0x13e   :  { %184 = vst.msk [vmem:[#allocation2] sm:$0xff] %vm31_vm0, %v179_v36 }
 0x149   :  { %v181_v26 = vpop.f32.mrf.mxu2 }
 0x14a   :  { %v182_v24 = vadd.f32 %v227_v14, %v181_v26 }
 0x14c   :  { %185 = vst.msk [vmem:[#allocation2 + $0x8] sm:$0xff] %vm31_vm0, %v182_v24 }
 0x14d   :  { %198 = dma.vmem_to_hbm [thread:$0]  %s191_s11, 256, %s193_s14, [#allocation3], %s264_s15, %s264_s15, %s265_s16  }
 0x14e   :  { %260 = dma.done.wait [#allocation3], 256  }
 0x14f   :  { %261 = vsyncadd [#allocation3], 4294967040 }
 0x150   :  { %203 = vsyncpa [#allocation3], 1 }

</bundles_post_ra>
